<compile_context>
chip_gen: v5e
topology: v5e:2x2
jax: 0.10.0
libtpu: 0.0.40
codegen_flags: <defaults>
</compile_context>

<pallas_src>
import jax
import jax.numpy as jnp
from jax import lax
from jax.experimental import pallas as pl
from jax.experimental.pallas import tpu as pltpu

_LANES = 128
_VMEM_LIMIT_BYTES = 32 * 1024 * 1024  # requested scoped VMEM; safe on v5e/v6e/v7x


# ----------------------------- kernels --------------------------------------


def _sign_kernel(x_ref, o_ref):
    """Eval forward (and noise-free training forward): (x >= 0)."""
    o_ref[...] = (x_ref[...] >= 0).astype(o_ref.dtype)


def _train_noise_kernel(x_ref, bits_ref, o_ref):
    """Training forward with Gumbel noise, rewritten as Bernoulli(sigmoid(x)).

    z = x + g1 - g2 with g1,g2 Gumbel  =>  g1-g2 ~ Logistic(0,1), and the
    straight-through forward value (sigmoid(z/T) >= 0.5) <=> (z >= 0) is
    exactly a Bernoulli(sigmoid(x)) draw:  u < sigmoid(x)  <=>
    u * (1 + exp(-x)) < 1  (strict '<' avoids the u == 0 corner bias).
    """
    x = x_ref[...].astype(jnp.float32)
    bits = bits_ref[...]
    # uniform in [0, 1) via exponent bitcast: [1,2) - 1
    u = lax.bitcast_convert_type(
        (bits >> 9) | jnp.uint32(0x3F800000), jnp.float32) - 1.0
    t = jnp.exp(-x)  # single transcendental per element (EUP)
    o_ref[...] = (u * (1.0 + t) < 1.0).astype(o_ref.dtype)


# ----------------------------- wrapper ---------------------------------------


def _sublane_granule(*dtypes):
    """Row granularity so blocks respect every streamed dtype's (sublane,128) tile."""
    g = 8
    for dt in dtypes:
        isz = jnp.dtype(dt).itemsize
        g = max(g, 8 * max(1, 4 // isz))  # f32/u32 -> 8, bf16 -> 16, i8 -> 32
    return g


def _pick_block_rows(rows, granule, itemsizes):
    """Block rows from a per-generation VMEM byte budget + >=2-step rule."""
    try:
        info = pltpu.get_tpu_info()
        vmem = getattr(info, "vmem_capacity_bytes", 64 * 1024 * 1024)
    except Exception:  # CPU / interpret fallback
        vmem = 64 * 1024 * 1024
    # Per-buffer-set budget (double-buffering doubles it); stays well under the
    # requested 32 MiB scoped limit and under v7x's smaller physical VMEM.
    budget = min(8 * 1024 * 1024, max(vmem // 8, 1024 * 1024))
    bytes_per_row = _LANES * sum(itemsizes)
    br = max(granule, (budget // bytes_per_row) // granule * granule)
    if rows > granule:
        # Guarantee >= 2 grid steps so "parallel" can shard across v7x's 2 TCs.
        half = ((rows + 1) // 2 + granule - 1) // granule * granule
        br = min(br, half)
    return min(br, rows)


def bin_concrete(x, gumbel_temp=0.66667, gumbel_noise=True, training=True,
                 key=None, out_dtype=None):
    """JAX/Pallas equivalent of BinConcrete.forward (forward value only).

    `gumbel_temp` does not affect the forward value (sign(z/T) == sign(z) for
    any T > 0); it only matters for the straight-through backward.
    `out_dtype` defaults to x.dtype (the {0,1} mask is exact in any dtype).
    """
    del gumbel_temp  # forward value is temperature-invariant
    out_dtype = x.dtype if out_dtype is None else jnp.dtype(out_dtype)
    orig_shape = x.shape
    n = x.size
    use_noise = bool(training) and bool(gumbel_noise)

    dtypes = [x.dtype, out_dtype] + ([jnp.uint32] if use_noise else [])
    granule = _sublane_granule(*dtypes)
    chunk = granule * _LANES

    # Lane-dense slab; fast path is a free contiguous reshape, only ragged
    # sizes pay a tail pad.
    flat = x.reshape(-1)
    padded_n = ((n + chunk - 1) // chunk) * chunk
    if padded_n != n:
        # TODO(synk): ragged tails pay an extra pad+slice HBM pass; a masked
        # final-block store (n as an SMEM scalar) would remove it.
        flat = jnp.pad(flat, (0, padded_n - n))
    x_slab = flat.reshape(padded_n // _LANES, _LANES)
    rows = x_slab.shape[0]

    itemsizes = [jnp.dtype(d).itemsize for d in dtypes]
    block_rows = _pick_block_rows(rows, granule, itemsizes)
    grid = (pl.cdiv(rows, block_rows),)

    spec = pl.BlockSpec((block_rows, _LANES), lambda i: (i, 0))
    out_shape = jax.ShapeDtypeStruct(x_slab.shape, out_dtype)
    cparams = pltpu.CompilerParams(
        dimension_semantics=("parallel",),
        vmem_limit_bytes=_VMEM_LIMIT_BYTES)

    if not use_noise:
        # Noise-free training forward == eval forward == sign test.
        out_slab = pl.pallas_call(
            _sign_kernel,
            out_shape=out_shape,
            grid=grid,
            in_specs=[spec],
            out_specs=spec,
            compiler_params=cparams,
        )(x_slab)
    else:
        if key is None:
            # NOTE: identical noise every call; pass a fresh key in training.
            key = jax.random.PRNGKey(0)
        bits = jax.random.bits(key, shape=x_slab.shape, dtype=jnp.uint32)
        out_slab = pl.pallas_call(
            _train_noise_kernel,
            out_shape=out_shape,
            grid=grid,
            in_specs=[spec, spec],
            out_specs=spec,
            compiler_params=cparams,
        )(x_slab, bits)

    out_flat = out_slab.reshape(-1)
    if padded_n != n:
        out_flat = out_flat[:n]
    return out_flat.reshape(orig_shape)


if __name__ == "__main__":
    key = jax.random.PRNGKey(0)
    kx, knoise = jax.random.split(key)
    x = jax.random.normal(kx, (2, 4, 16, 16), dtype=jnp.float32)

    # Training path (single-uniform Bernoulli(sigmoid(x)) == Gumbel forward).
    out_train = jax.block_until_ready(
        bin_concrete(x, gumbel_temp=0.66667, gumbel_noise=True,
                     training=True, key=knoise))
    assert out_train.shape == x.shape
    assert not bool(jnp.any(jnp.isnan(out_train)))
    assert bool(jnp.all((out_train == 0.0) | (out_train == 1.0)))

    ref_sign = (x >= 0).astype(jnp.float32)

    # Training without noise reduces to the sign test.
    out_nonoise = jax.block_until_ready(
        bin_concrete(x, gumbel_noise=False, training=True))
    assert bool(jnp.all(out_nonoise == ref_sign))

    # Eval path: (x >= 0).float()
    out_eval = jax.block_until_ready(bin_concrete(x, training=False))
    assert bool(jnp.all(out_eval == ref_sign))

    # bf16 I/O stays bf16 end-to-end (no up-front f32 cast pass).
    x_bf = x.astype(jnp.bfloat16)
    out_bf = jax.block_until_ready(
        bin_concrete(x_bf, gumbel_noise=True, training=True, key=knoise))
    assert out_bf.dtype == jnp.bfloat16
    assert bool(jnp.all((out_bf == 0) | (out_bf == 1)))

    # Narrow mask output (write-traffic saver for consumers that take int8).
    out_i8 = jax.block_until_ready(
        bin_concrete(x, training=False, out_dtype=jnp.int8))
    assert out_i8.dtype == jnp.int8
    assert bool(jnp.all(out_i8 == ref_sign.astype(jnp.int8)))

    # Ragged-size input exercises the tail-pad / unpad branch.
    x_rag = jax.random.normal(kx, (3, 5, 7), dtype=jnp.float32)
    out_rag = jax.block_until_ready(
        bin_concrete(x_rag, gumbel_noise=True, training=True, key=knoise))
    assert out_rag.shape == x_rag.shape
    assert bool(jnp.all((out_rag == 0.0) | (out_rag == 1.0)))

    print("KERNEL_OK")
</pallas_src>

<mosaic_0001>
module attributes {stable_mosaic.version = 11 : i64} {
  func.func @_train_noise_kernel(%arg0: i32, %arg1: memref<8x128xf32, #tpu.memory_space<vmem>>, %arg2: memref<8x128xi32, #tpu.memory_space<vmem>>, %arg3: memref<8x128xf32, #tpu.memory_space<vmem>>) attributes {dimension_semantics = [#tpu.dimension_semantics<parallel>], iteration_bounds = array<i64: 2>, scalar_prefetch = 0 : i64, scratch_operands = 0 : i64, tpu.core_type = #tpu.core_type<tc>, window_params = [{transform_indices = @transform_0, window_bounds = array<i64: 8, 128>}, {transform_indices = @transform_1, window_bounds = array<i64: 8, 128>}, {transform_indices = @transform_2, window_bounds = array<i64: 8, 128>}]} {
    %c0 = arith.constant 0 : index
    %c0_0 = arith.constant 0 : index
    %0 = vector.load %arg1[%c0, %c0_0] : memref<8x128xf32, #tpu.memory_space<vmem>>, vector<8x128xf32>
    %c0_1 = arith.constant 0 : index
    %c0_2 = arith.constant 0 : index
    %1 = vector.load %arg2[%c0_1, %c0_2] : memref<8x128xi32, #tpu.memory_space<vmem>>, vector<8x128xi32>
    %c9_i32 = arith.constant 9 : i32
    %2 = vector.broadcast %c9_i32 : i32 to vector<8x128xi32>
    %3 = arith.shrui %1, %2 : vector<8x128xi32>
    %c1065353216_i32 = arith.constant 1065353216 : i32
    %4 = vector.broadcast %c1065353216_i32 : i32 to vector<8x128xi32>
    %5 = arith.ori %3, %4 : vector<8x128xi32>
    %6 = tpu.bitcast %5 : vector<8x128xi32> -> vector<8x128xf32>
    %cst = arith.constant 1.000000e+00 : f32
    %7 = vector.broadcast %cst : f32 to vector<8x128xf32>
    %8 = arith.subf %6, %7 : vector<8x128xf32>
    %cst_3 = arith.constant 0.000000e+00 : f32
    %9 = vector.broadcast %cst_3 : f32 to vector<8x128xf32>
    %10 = arith.subf %9, %0 : vector<8x128xf32>
    %11 = math.exp %10 : vector<8x128xf32>
    %cst_4 = arith.constant 1.000000e+00 : f32
    %12 = vector.broadcast %cst_4 : f32 to vector<8x128xf32>
    %13 = arith.addf %12, %11 : vector<8x128xf32>
    %14 = arith.mulf %8, %13 : vector<8x128xf32>
    %cst_5 = arith.constant 1.000000e+00 : f32
    %15 = vector.broadcast %cst_5 : f32 to vector<8x128xf32>
    %16 = arith.cmpf olt, %14, %15 : vector<8x128xf32>
    %17 = arith.extui %16 : vector<8x128xi1> to vector<8x128xi32>
    %18 = arith.sitofp %17 : vector<8x128xi32> to vector<8x128xf32>
    %c0_6 = arith.constant 0 : index
    %c0_7 = arith.constant 0 : index
    %19 = vector.load %arg3[%c0_6, %c0_7] : memref<8x128xf32, #tpu.memory_space<vmem>>, vector<8x128xf32>
    tpu.vector_store %arg3[%c0_6, %c0_7], %18 {strides = array<i32>} : memref<8x128xf32, #tpu.memory_space<vmem>>, vector<8x128xf32>,
    return
  }
  func.func @transform_0(%arg0: i32) -> (i32, i32) {
    %c0_i32 = arith.constant 0 : i32
    %c0_i32_0 = arith.constant 0 : i32
    return %arg0, %c0_i32 : i32, i32
  }
  func.func @transform_1(%arg0: i32) -> (i32, i32) {
    %c0_i32 = arith.constant 0 : i32
    %c0_i32_0 = arith.constant 0 : i32
    return %arg0, %c0_i32 : i32, i32
  }
  func.func @transform_2(%arg0: i32) -> (i32, i32) {
    %c0_i32 = arith.constant 0 : i32
    %c0_i32_0 = arith.constant 0 : i32
    return %arg0, %c0_i32 : i32, i32
  }
}

</mosaic_0001>

<bundles_post_ra>
// kernel: tpu_custom_call.1
= control target key start
LH: loop header
LB: loop body
LE: loop exit
PB: predicated region body
PF: predicated region fallthrough
CT: control target
= control target key end

     0   :  { %7 = vsyncpa [#allocation3], 0  ;;  %s708_s0 = inlined_call_operand.hbm [shape: f32[16,128], index: 0, kind: input, shape index: {}]   ;;  %s709_s1 = inlined_call_operand.hbm [shape: u32[16,128], index: 1, kind: input, shape index: {}]   ;;  %s710_s2 = inlined_call_operand.hbm [shape: f32[16,128], index: 2, kind: output, shape index: {}]  }
   0x1   :  { %9 = vsyncpa [#allocation3 + $0x1], 0 }
   0x2   :  { %10 = vsyncpa [#allocation6], 0 }
   0x3   :  { %12 = vsyncpa [#allocation6 + $0x1], 0 }
   0x4   :  { %13 = vsyncpa [#allocation4], 0 }
   0x5   :  { %15 = vsyncpa [#allocation4 + $0x1], 0  ;;  %s543_s9 = smov 0   ;;  %s545_s10 = smov 0  }
   0x6   :  { %s547_s11 = smov 0   ;;  %s549_s12 = smov 0  }
   0x7 LB: > { %s564_s13 = sadd.s32 4294967295, %s525_s12   ;;  %s324_s14 = sadd.s32 4294967294, %s525_s12   ;;  %s525_s12 = sphi %s549_s12, %s721_s12   ;;  %s521_s11 = sphi %s547_s11, %s720_s11   ;;  %s517_s10 = sphi %s545_s10, %s719_s10   ;;  %s513_s9 = sphi %s543_s9, %s718_s9  }
   0x8   : > { %s568_s15 = sadd.s32 1, %s525_s12   ;;  %s28_s16 = sadd.s32 1, %s521_s11 }
   0x9   : > { %s25_s17 = ssub.s32 %s525_s12, %s568_s15  ;;  %p35_p0 = scmp.ne.s32.totalorder %s521_s11, %s517_s10 }
   0xa   : > { %p26_p1 = scmp.eq.s32.totalorder %s25_s17, 0  ;;  %p36_p2 = scmp.eq.s32.totalorder %s525_s12, 0 }
   0xb   : > { %p41_p3 = scmp.ne.s32.totalorder %s517_s10, %s513_s9  ;;  %p42_p4 = scmp.eq.s32.totalorder %s564_s13, 0 }
   0xc   : > { %s580_s18 = scalar_select %p26_p1, %s521_s11, %s28_s16  }
   0xd   : > { %p582_p5 = por %p36_p2, %p35_p0  ;;  %p586_p6 = por %p42_p4, %p41_p3 }
   0xe   : > { %p91_p7 = scmp.eq.s32.totalorder %s564_s13, 1  ;;  %p97_p8 = scmp.eq.s32.totalorder %s324_s14, 1 }
   0xf   : > { %p358_p10 = scmp.lt.s32.totalorder %s525_s12, 2  ;;  %s602_s23 = sand.u32 1, %s521_s11  }
  0x10   : > { %p593_p11 = por %p91_p7, %p35_p0  ;;  %p597_p12 = por %p97_p8, %p41_p3 }
  0x11   : > { %s328_s24 = sshll.u32 %s525_s12, 3  ;;  %s327_s25 = sshll.u32 %s602_s23, 3 }
  0x12   : > { %s125_s28 = scalar_lea.hbm %s708_s0, %s328_s24  ;;  %s121_s30 = scalar_lea.vmem [#allocation2], %s327_s25 }
  0x13   : > { %s127_s29 = sshll.u32 %s125_s28, 4  ;;  %s129_s3 = sshll.u32 %s121_s30, 4  ;;  %s128_s29 = int_to_ptr.hbm [resolvable:$true] %s127_s29  ;;  %s130_s3 = int_to_ptr.vmem [resolvable:$true] %s129_s3 }
  0x14   : > { %p611_p13 = pnand %p358_p10, %p582_p5  ;;  %p331_p0 = scmp.ge.s32.totalorder %s525_s12, 1 }
  0x15   : > { %p153_p1 = scmp.lt.s32.totalorder %s525_s12, 3  ;;  %s118_s5 = scalar_lea.sflag [#allocation3], %s602_s23 }
  0x16   : > { %s395_s6 = sshra.s32 %s128_s29, 4  ;;  %p399_p3 = pneg %p611_p13  ;;  %s396_s6 = int_to_ptr.hbm [resolvable:$true] %s395_s6 }
  0x17   : > { %s397_s7 = scalar_lea.hbm %s396_s6, 8  ;;  %s402_s16 = scalar_lea.hbm %s708_s0, 16 }
  0x18   : > { %p398_p2 = scmp.ne.s32.totalorder %s396_s6, %s397_s7  ;;  %p403_p5 = scmp.lt.s32.totalorder %s396_s6, %s708_s0 }
  0x19   : > { %p404_p8 = scmp.lt.s32.totalorder %s402_s16, %s397_s7 }
  0x1a   : > { %p400_p4 = pnand %p399_p3, %p398_p2 }
  0x1b   : > { %p405_p10 = por %p404_p8, %p403_p5 }
  0x1c   : > { %p401_p7 = pneg %p400_p4 }
  0x1e   : > { %p406_p9 = pnand %p405_p10, %p401_p7 }
  0x20   : > { %409 = shalt.err (!%p406_p9)
}
  0x21   : > { %350 = dma.hbm_to_vmem [thread:$0]  (!%p611_p13), %s128_s29, 128, %s130_s3, %s118_s5  }
  0x22   : > { %p635_p2 = pnand %p331_p0, %p153_p1  ;;  %s144_s30 = scalar_lea.hbm %s709_s1, %s328_s24 }
  0x23   : > { %s146_s6 = sshll.u32 %s144_s30, 4  ;;  %s140_s7 = scalar_lea.vmem [#allocation5], %s327_s25  ;;  %s147_s6 = int_to_ptr.hbm [resolvable:$true] %s146_s6 }
  0x24   : > { %s148_s8 = sshll.u32 %s140_s7, 4  ;;  %s137_s14 = scalar_lea.sflag [#allocation6], %s602_s23  ;;  %s149_s8 = int_to_ptr.vmem [resolvable:$true] %s148_s8 }
  0x25   : > { %s425_s16 = sshra.s32 %s147_s6, 4  ;;  %s432_s5 = scalar_lea.hbm %s709_s1, 16  ;;  %s426_s16 = int_to_ptr.hbm [resolvable:$true] %s425_s16 }
  0x26   : > { %s427_s17 = scalar_lea.hbm %s426_s16, 8  ;;  %p433_p4 = scmp.lt.s32.totalorder %s426_s16, %s709_s1 }
  0x27   : > { %p428_p9 = scmp.ne.s32.totalorder %s426_s16, %s427_s17  ;;  %p434_p7 = scmp.lt.s32.totalorder %s432_s5, %s427_s17 }
  0x29   : > { %p430_p0 = pnand %p428_p9, %p399_p3  ;;  %p435_p5 = por %p434_p7, %p433_p4 }
  0x2b   : > { %p431_p1 = pneg %p430_p0 }
  0x2d   : > { %p436_p8 = pnand %p435_p5, %p431_p1 }
  0x2f   : > { %439 = shalt.err (!%p436_p8)
}
  0x30   : > { %353 = dma.hbm_to_vmem [thread:$0]  (!%p611_p13), %s147_s6, 128, %s149_s8, %s137_s14  }
  0x31   : > { %157 = sbr.rel (%p635_p2) target bundleno = 78 (0x4e), region = 28  ;;  %s657_s23 = sand.u32 (!%p635_p2), 1, %s517_s10  }
  0x32   : > { %s660_s25 = sshll.u32 (!%p635_p2), %s657_s23, 3  ;;  %s160_s27 = scalar_lea.sflag (!%p635_p2), [#allocation3], %s657_s23 }
  0x33   : > { %s163_s28 = scalar_lea.vmem (!%p635_p2), [#allocation2], %s660_s25 }
  0x36   : > { %500 = dma.done.wait (%p586_p6), %s160_s27, 128  }
  0x37   : > { %502 = vsyncadd (%p586_p6), %s160_s27, 4294967168  ;;  %s170_s4 = scalar_lea.sflag [#allocation6], %s657_s23  ;;  %s173_s26 = scalar_lea.vmem [#allocation5], %s660_s25 }
  0x38   : > { %504 = dma.done.wait (%p586_p6), %s170_s4, 128  }
  0x39   : > { %506 = vsyncadd (%p586_p6), %s170_s4, 4294967168  ;;  %v200_v0 = vld [vmem:[%s163_s28] sm:$0xff]  ;;  %v201_v1 = vld [vmem:[%s173_s26] sm:$0xff]  ;;  %s338_s30 = sshll.u32 %s564_s13, 3  ;;  %s199_s20 = scalar_lea.vmem [#allocation7], %s660_s25  ;;  %v527_v10 = vmov 0.0  }
  0x3a   : > { %v206_v2 = vsub.f32 0.0, %v200_v0  ;;  %v202_v3 = vshrl.u32 %v201_v1, 9  ;;  %s226_s8 = scalar_lea.hbm %s710_s2, %s338_s30  ;;  %s228_s14 = sshll.u32 %s199_s20, 4  ;;  %s229_s14 = int_to_ptr.vmem [resolvable:$true] %s228_s14 }
  0x3b   : > { %s230_s16 = sshll.u32 %s226_s8, 4  ;;  %s216_s17 = scalar_lea.sflag [#allocation4], %s657_s23  ;;  %s231_s16 = int_to_ptr.hbm [resolvable:$true] %s230_s16 }
  0x3c   : > { %v207_v4 = vmul.f32 1.442695, %v206_v2  ;;  %v203_v5 = vor.u32 1065353216, %v202_v3  ;;  %s469_s13 = sshra.s32 %s231_s16, 4  ;;  %s475_s19 = scalar_lea.hbm %s710_s2, 16  ;;  %s470_s13 = int_to_ptr.hbm [resolvable:$true] %s469_s13 }
  0x3d   : > { %s471_s29 = scalar_lea.hbm %s470_s13, 8  ;;  %p476_p10 = scmp.lt.s32.totalorder %s470_s13, %s710_s2 }
  0x3e   : > { %393 = vpow2.f32 %v207_v4  ;;  %v335_v6 = vadd.f32 -1.0, %v203_v5  ;;  %p472_p6 = scmp.ne.s32.totalorder %s470_s13, %s471_s29  ;;  %p477_p2 = scmp.lt.s32.totalorder %s475_s19, %s471_s29 }
  0x40   : > { %p473_p13 = pnand %p472_p6, %p593_p11  ;;  %p478_p9 = por %p477_p2, %p476_p10 }
  0x42   : > { %p474_p3 = pneg %p473_p13 }
  0x44   : > { %v394_v7 = vpop.eup %393  ;;  %p479_p0 = pnand %p478_p9, %p474_p3 }
  0x45   : > { %v209_v8 = vadd.f32 1.0, %v394_v7 }
  0x47   : > { %v210_v9 = vmul.f32 %v335_v6, %v209_v8 }
  0x49   : > { %vm211_vm0 = vcmp.lt.f32.partialorder %v210_v9, 1.0 }
  0x4a   : > { %v336_v11 = vsel %vm211_vm0, 1.0, %v527_v10 }
  0x4b   : > { %214 = vst [vmem:[%s199_s20] sm:$0xff] %v336_v11 }
  0x4c   : > { %482 = shalt.err (!%p479_p0)
}
  0x4d   : > { %345 = dma.vmem_to_hbm [thread:$0]  (%p593_p11), %s229_s14, 128, %s231_s16, %s216_s17  }
  0x4e PF: > { %s242_s23 = sand.u32 1, %s513_s9   ;;  %p717_p1 = scmp.ge.s32.totalorder %s525_s12, 2 }
  0x4f   : > { %s243_s27 = scalar_lea.sflag [#allocation4], %s242_s23 }
  0x50   : > { %p355_p4 = pnand %p717_p1, %p597_p12 }
  0x52   : > { %p356_p7 = pneg %p355_p4 }
  0x54   : > { %508 = dma.done.wait (%p356_p7), %s243_s27, 128  }
  0x55   : > { %510 = vsyncadd (%p356_p7), %s243_s27, 4294967168  ;;  %p18_p5 = scmp.ge.s32.totalorder %s568_s15, 4   ;;  %s718_s9 = smov %s517_s10 }
  0x56   : > { %s719_s10 = smov %s521_s11  ;;  %s720_s11 = smov %s580_s18 }
  0x57   : > { %s721_s12 = smov %s568_s15  ;;  %20 = sbr.rel (!%p18_p5) target bundleno = 7 (0x7), region = 86 }
  0x5c   :  { %249 = vsyncpa [#allocation3], 1 }
  0x5d   :  { %251 = vsyncpa [#allocation3 + $0x1], 1 }
  0x5e   :  { %252 = vsyncpa [#allocation6], 1 }
  0x5f   :  { %254 = vsyncpa [#allocation6 + $0x1], 1 }
  0x60   :  { %255 = vsyncpa [#allocation4], 1 }
  0x61   :  { %257 = vsyncpa [#allocation4 + $0x1], 1 }

</bundles_post_ra>
